<compile_context>
chip_gen: v6e
topology: v6e:2x2x1
jax: 0.10.0
libtpu: 0.0.40
codegen_flags: <defaults>
</compile_context>

<pallas_src>
import functools
import math

import jax
import jax.numpy as jnp
from jax.experimental import pallas as pl
from jax.experimental.pallas import tpu as pltpu


# ----------------------------- config (small, consistent with the module) -----
IN_MELS = 4
IN_WIDTH = 16
DIN = IN_MELS * IN_WIDTH           # 64
DOUT_PAD = 128                     # lane-padded fc_out width (sliced back to DIN outside)
EMB = 128                          # embedding_dim (lane-aligned)
NUM_HIDDEN = 3
NUM_TIMESTEPS = 16
T_PAD = 128                        # timestep table padded to a clean MXU contracting dim
BLOCK_B = 128                      # batch tile (rows per grid step)


# ----------------------------- timestep embedding (matches the PyTorch helper) -
def get_timestep_embedding(timesteps, embedding_dim):
    assert timesteps.ndim == 1
    half_dim = embedding_dim // 2
    emb = math.log(10000.0) / (half_dim - 1)
    emb = jnp.exp(jnp.arange(half_dim, dtype=jnp.float32) * -emb)
    emb = timesteps.astype(jnp.float32)[:, None] * emb[None, :]
    emb = jnp.concatenate([jnp.sin(emb), jnp.cos(emb)], axis=1)
    if embedding_dim % 2 == 1:
        emb = jnp.pad(emb, ((0, 0), (0, 1)))
    return emb


# ----------------------------- fused MLP kernel --------------------------------
def mel_mlp_kernel(x_ref, t_ref, w_in_ref, b_in_ref, wh1_ref, tbias_ref,
                   w_out_ref, b_out_ref, o_ref, *, num_hidden):
    # fc_in + ReLU (bf16 MXU dot, f32 accumulate; elementwise stays f32)
    x = x_ref[...].astype(jnp.bfloat16)                                  # (TB, DIN)
    h = jnp.dot(x, w_in_ref[...], preferred_element_type=jnp.float32) + b_in_ref[...]
    h = jnp.maximum(h, 0.0)

    # In-kernel selection of the folded per-timestep bias rows:
    #   tb = onehot(t) (TB, T_PAD) @ t_bias_table (T_PAD, H*E)   -> (TB, H*E)
    # (exact row selection: one-hot entries are exactly 0.0 / 1.0)
    t = t_ref[...]                                                       # (TB, 1) int32
    iota_t = jax.lax.broadcasted_iota(jnp.int32, (t.shape[0], T_PAD), 1)
    one_hot = (iota_t == t).astype(jnp.float32)
    tb = jnp.dot(one_hot, tbias_ref[...], preferred_element_type=jnp.float32)

    # hidden layers: relu(concat([h, temb]) @ W_i + b_i) with the temb half + bias
    # pre-folded into tb (per-row), so only one dot per layer remains.
    for i in range(num_hidden):
        bias_i = tb[:, i * EMB:(i + 1) * EMB]
        h = (jnp.dot(h.astype(jnp.bfloat16), wh1_ref[i],
                     preferred_element_type=jnp.float32)
             + bias_i)
        h = jnp.maximum(h, 0.0)

    # fc_out (no activation); lane-padded to DOUT_PAD=128 for dense stores.
    o = (jnp.dot(h.astype(jnp.bfloat16), w_out_ref[...],
                 preferred_element_type=jnp.float32)
         + b_out_ref[...])
    o_ref[...] = o.astype(o_ref.dtype)


def mel_mlp_forward(x, timesteps, kparams, *, block_b=BLOCK_B):
    """x: (B, IN_MELS, IN_WIDTH) f32, timesteps: (B,) int32."""
    b = x.shape[0]
    x_flat = x.reshape(b, -1).astype(jnp.float32)                        # torch.nn.Flatten
    t2d = timesteps.astype(jnp.int32).reshape(b, 1)                      # 4 B/row into kernel

    # Pad batch to a multiple of the batch tile (padded rows are sliced off below).
    b_pad = block_b * pl.cdiv(b, block_b)
    if b_pad != b:
        x_flat = jnp.pad(x_flat, ((0, b_pad - b), (0, 0)))
        t2d = jnp.pad(t2d, ((0, b_pad - b), (0, 0)))

    grid = (b_pad // block_b,)
    out_pad = pl.pallas_call(
        functools.partial(mel_mlp_kernel, num_hidden=NUM_HIDDEN),
        out_shape=jax.ShapeDtypeStruct((b_pad, DOUT_PAD), jnp.float32),
        grid=grid,
        in_specs=[
            # batch-tiled activations / per-row timesteps
            pl.BlockSpec((block_b, DIN), lambda i: (i, 0)),                   # x
            pl.BlockSpec((block_b, 1), lambda i: (i, 0)),                     # timesteps
            # weights/tables: constant block index -> VMEM-resident across grid steps
            pl.BlockSpec((DIN, EMB), lambda i: (0, 0)),                       # w_in  (bf16)
            pl.BlockSpec((1, EMB), lambda i: (0, 0)),                         # b_in  (f32)
            pl.BlockSpec((NUM_HIDDEN, EMB, EMB), lambda i: (0, 0, 0)),        # wh1   (bf16)
            pl.BlockSpec((T_PAD, NUM_HIDDEN * EMB), lambda i: (0, 0)),        # t_bias (f32)
            pl.BlockSpec((EMB, DOUT_PAD), lambda i: (0, 0)),                  # w_out (bf16)
            pl.BlockSpec((1, DOUT_PAD), lambda i: (0, 0)),                    # b_out (f32)
        ],
        out_specs=pl.BlockSpec((block_b, DOUT_PAD), lambda i: (i, 0)),
        compiler_params=pltpu.CompilerParams(
            dimension_semantics=("parallel",),        # shard batch tiles across TCs (v7x)
            vmem_limit_bytes=32 * 1024 * 1024),
    )(x_flat, t2d,
      kparams["w_in"], kparams["b_in"], kparams["wh1"], kparams["t_bias_table"],
      kparams["w_out"], kparams["b_out"])

    return out_pad[:b, :DIN].reshape(b, IN_MELS, IN_WIDTH)                # torch.nn.Unflatten


# ----------------------------- deterministic parameter init --------------------
def init_params(key):
    def uniform(key, shape, fan_in):
        k = 1.0 / math.sqrt(fan_in)
        return jax.random.uniform(key, shape, jnp.float32, minval=-k, maxval=k)

    keys = jax.random.split(key, 8)
    return {
        # fc_in: Linear(DIN, EMB) stored as (in, out)
        "w_in": uniform(keys[0], (DIN, EMB), DIN),
        "b_in": uniform(keys[1], (1, EMB), DIN),
        # hidden fc_i: Linear(2*EMB, EMB) split into the x1-half and the t_emb-half
        "wh1": uniform(keys[2], (NUM_HIDDEN, EMB, EMB), 2 * EMB),
        "wh2": uniform(keys[3], (NUM_HIDDEN, EMB, EMB), 2 * EMB),
        "bh": uniform(keys[4], (NUM_HIDDEN, 1, EMB), 2 * EMB),
        # fc_out: Linear(EMB, DIN)
        "w_out": uniform(keys[5], (EMB, DIN), EMB),
        "b_out": uniform(keys[6], (1, DIN), EMB),
        # fixed (non-trainable) sinusoidal table, same as the PyTorch buffer
        "t_emb_table": get_timestep_embedding(
            jnp.arange(NUM_TIMESTEPS, dtype=jnp.int32), EMB),
    }


def pack_for_kernel(params):
    """Derive kernel-side parameters: bf16 weights, lane-padded fc_out, and the
    folded per-timestep bias table t_bias[t, i, :] = t_emb[t] @ wh2[i] + bh[i]
    (computed once in full f32, stored as a (T_PAD, H*E) f32 table)."""
    t_bias = (jnp.einsum("te,heo->tho", params["t_emb_table"], params["wh2"])
              + params["bh"][:, 0, :][None, :, :])                       # (T, H, E) f32
    t_bias_flat = t_bias.reshape(NUM_TIMESTEPS, NUM_HIDDEN * EMB)
    t_bias_flat = jnp.pad(t_bias_flat,
                          ((0, T_PAD - NUM_TIMESTEPS), (0, 0)))          # (T_PAD, H*E)

    w_out_pad = jnp.zeros((EMB, DOUT_PAD), jnp.float32).at[:, :DIN].set(params["w_out"])
    b_out_pad = jnp.zeros((1, DOUT_PAD), jnp.float32).at[:, :DIN].set(params["b_out"])

    return {
        "w_in": params["w_in"].astype(jnp.bfloat16),
        "b_in": params["b_in"],
        "wh1": params["wh1"].astype(jnp.bfloat16),
        "w_out": w_out_pad.astype(jnp.bfloat16),
        "b_out": b_out_pad,
        "t_bias_table": t_bias_flat,
    }


# ----------------------------- pure-JAX reference for sanity -------------------
def mel_mlp_ref(x, timesteps, params):
    """Follows the original module exactly (concat -> single matmul per hidden layer),
    with the streamed weights quantized through bf16 to match the kernel's storage;
    the (fixed) t_emb branch stays in f32 like the kernel's folded table."""
    q = lambda w: w.astype(jnp.bfloat16).astype(jnp.float32)
    x1 = x.reshape(x.shape[0], -1) @ q(params["w_in"]) + params["b_in"]
    x1 = jnp.maximum(x1, 0.0)
    temb = params["t_emb_table"][timesteps]
    for i in range(NUM_HIDDEN):
        cat = jnp.concatenate([x1, temb], axis=1)
        w = jnp.concatenate([q(params["wh1"][i]), params["wh2"][i]], axis=0)
        x1 = jnp.maximum(cat @ w + params["bh"][i], 0.0)
    out = x1 @ q(params["w_out"]) + params["b_out"]
    return out.reshape(x.shape[0], IN_MELS, IN_WIDTH)


if __name__ == "__main__":
    key = jax.random.PRNGKey(0)
    k_x, k_t, k_p = jax.random.split(key, 3)

    params = init_params(k_p)
    kparams = pack_for_kernel(params)

    # Small module-shaped batch (B=2) and a larger batch that exercises the batched
    # grid / weight amortization (grid=(2,) with the weights VMEM-resident).
    for b in (2, 256):
        kx = jax.random.fold_in(k_x, b)
        kt = jax.random.fold_in(k_t, b)
        x = jax.random.normal(kx, (b, IN_MELS, IN_WIDTH), jnp.float32)
        timesteps = jax.random.randint(kt, (b,), 0, NUM_TIMESTEPS, jnp.int32)

        out = jax.block_until_ready(mel_mlp_forward(x, timesteps, kparams))
        ref = mel_mlp_ref(x, timesteps, params)

        assert out.shape == (b, IN_MELS, IN_WIDTH)
        # bf16 weights + bf16 activation casts at the dot inputs -> relaxed tolerance
        assert jnp.allclose(out, ref, atol=5e-2, rtol=5e-2), \
            float(jnp.max(jnp.abs(out - ref)))

    print("KERNEL_OK")
</pallas_src>

<mosaic_0001>
module attributes {stable_mosaic.version = 11 : i64} {
  func.func @mel_mlp_kernel(%arg0: i32, %arg1: memref<128x64xf32, #tpu.memory_space<vmem>>, %arg2: memref<128x1xi32, #tpu.memory_space<vmem>>, %arg3: memref<64x128xbf16, #tpu.memory_space<vmem>>, %arg4: memref<1x128xf32, #tpu.memory_space<vmem>>, %arg5: memref<3x128x128xbf16, #tpu.memory_space<vmem>>, %arg6: memref<128x384xf32, #tpu.memory_space<vmem>>, %arg7: memref<128x128xbf16, #tpu.memory_space<vmem>>, %arg8: memref<1x128xf32, #tpu.memory_space<vmem>>, %arg9: memref<128x128xf32, #tpu.memory_space<vmem>>) attributes {dimension_semantics = [#tpu.dimension_semantics<parallel>], iteration_bounds = array<i64: 1>, scalar_prefetch = 0 : i64, scratch_operands = 0 : i64, tpu.core_type = #tpu.core_type<tc>, window_params = [{transform_indices = @transform_0, window_bounds = array<i64: 128, 64>}, {transform_indices = @transform_1, window_bounds = array<i64: 128, 1>}, {pipeline_mode = #tpu.pipeline_mode<synchronous>, transform_indices = @transform_2, window_bounds = array<i64: 64, 128>}, {pipeline_mode = #tpu.pipeline_mode<synchronous>, transform_indices = @transform_3, window_bounds = array<i64: 1, 128>}, {pipeline_mode = #tpu.pipeline_mode<synchronous>, transform_indices = @transform_4, window_bounds = array<i64: 3, 128, 128>}, {pipeline_mode = #tpu.pipeline_mode<synchronous>, transform_indices = @transform_5, window_bounds = array<i64: 128, 384>}, {pipeline_mode = #tpu.pipeline_mode<synchronous>, transform_indices = @transform_6, window_bounds = array<i64: 128, 128>}, {pipeline_mode = #tpu.pipeline_mode<synchronous>, transform_indices = @transform_7, window_bounds = array<i64: 1, 128>}, {transform_indices = @transform_8, window_bounds = array<i64: 128, 128>}]} {
    %c0 = arith.constant 0 : index
    %c0_0 = arith.constant 0 : index
    %0 = vector.load %arg1[%c0, %c0_0] : memref<128x64xf32, #tpu.memory_space<vmem>>, vector<128x64xf32>
    %1 = arith.truncf %0 : vector<128x64xf32> to vector<128x64xbf16>
    %c0_1 = arith.constant 0 : index
    %c0_2 = arith.constant 0 : index
    %2 = vector.load %arg3[%c0_1, %c0_2] : memref<64x128xbf16, #tpu.memory_space<vmem>>, vector<64x128xbf16>
    %cst = arith.constant dense<0.000000e+00> : vector<128x128xf32>
    %3 = tpu.matmul %1, %2, %cst {dimension_numbers = #tpu.dot_dimension_numbers<[1], [0], [0], [1], [0, 0, 1, 1], [], []>} : vector<128x64xbf16>, vector<64x128xbf16>, vector<128x128xf32> -> vector<128x128xf32>
    %c0_3 = arith.constant 0 : index
    %c0_4 = arith.constant 0 : index
    %4 = vector.load %arg4[%c0_3, %c0_4] : memref<1x128xf32, #tpu.memory_space<vmem>>, vector<1x128xf32>
    %5 = vector.broadcast %4 : vector<1x128xf32> to vector<128x128xf32>
    %6 = arith.addf %3, %5 : vector<128x128xf32>
    %cst_5 = arith.constant 0.000000e+00 : f32
    %7 = vector.broadcast %cst_5 : f32 to vector<128x128xf32>
    %8 = arith.maximumf %6, %7 : vector<128x128xf32>
    %c0_6 = arith.constant 0 : index
    %c0_7 = arith.constant 0 : index
    %9 = vector.load %arg2[%c0_6, %c0_7] : memref<128x1xi32, #tpu.memory_space<vmem>>, vector<128x1xi32>
    %10 = tpu.iota {dimensions = array<i32: 1>} : vector<128x128xi32>
    %11 = vector.broadcast %9 : vector<128x1xi32> to vector<128x128xi32>
    %12 = arith.cmpi eq, %10, %11 : vector<128x128xi32>
    %13 = arith.extui %12 : vector<128x128xi1> to vector<128x128xi32>
    %14 = arith.sitofp %13 : vector<128x128xi32> to vector<128x128xf32>
    %c0_8 = arith.constant 0 : index
    %c0_9 = arith.constant 0 : index
    %15 = vector.load %arg6[%c0_8, %c0_9] : memref<128x384xf32, #tpu.memory_space<vmem>>, vector<128x384xf32>
    %cst_10 = arith.constant dense<0.000000e+00> : vector<128x384xf32>
    %16 = tpu.matmul %14, %15, %cst_10 {dimension_numbers = #tpu.dot_dimension_numbers<[1], [0], [0], [1], [0, 0, 1, 1], [], []>} : vector<128x128xf32>, vector<128x384xf32>, vector<128x384xf32> -> vector<128x384xf32>
    %17 = vector.extract_strided_slice %16 {offsets = [0, 0], sizes = [128, 128], strides = [1, 1]} : vector<128x384xf32> to vector<128x128xf32>
    %18 = arith.truncf %8 : vector<128x128xf32> to vector<128x128xbf16>
    %c0_11 = arith.constant 0 : index
    %c0_12 = arith.constant 0 : index
    %c0_13 = arith.constant 0 : index
    %19 = vector.load %arg5[%c0_11, %c0_12, %c0_13] : memref<3x128x128xbf16, #tpu.memory_space<vmem>>, vector<1x128x128xbf16>
    %20 = vector.shape_cast %19 : vector<1x128x128xbf16> to vector<128x128xbf16>
    %cst_14 = arith.constant dense<0.000000e+00> : vector<128x128xf32>
    %21 = tpu.matmul %18, %20, %cst_14 {dimension_numbers = #tpu.dot_dimension_numbers<[1], [0], [0], [1], [0, 0, 1, 1], [], []>} : vector<128x128xbf16>, vector<128x128xbf16>, vector<128x128xf32> -> vector<128x128xf32>
    %22 = arith.addf %21, %17 : vector<128x128xf32>
    %cst_15 = arith.constant 0.000000e+00 : f32
    %23 = vector.broadcast %cst_15 : f32 to vector<128x128xf32>
    %24 = arith.maximumf %22, %23 : vector<128x128xf32>
    %25 = vector.extract_strided_slice %16 {offsets = [0, 128], sizes = [128, 128], strides = [1, 1]} : vector<128x384xf32> to vector<128x128xf32>
    %26 = arith.truncf %24 : vector<128x128xf32> to vector<128x128xbf16>
    %c1 = arith.constant 1 : index
    %c0_16 = arith.constant 0 : index
    %c0_17 = arith.constant 0 : index
    %27 = vector.load %arg5[%c1, %c0_16, %c0_17] : memref<3x128x128xbf16, #tpu.memory_space<vmem>>, vector<1x128x128xbf16>
    %28 = vector.shape_cast %27 : vector<1x128x128xbf16> to vector<128x128xbf16>
    %cst_18 = arith.constant dense<0.000000e+00> : vector<128x128xf32>
    %29 = tpu.matmul %26, %28, %cst_18 {dimension_numbers = #tpu.dot_dimension_numbers<[1], [0], [0], [1], [0, 0, 1, 1], [], []>} : vector<128x128xbf16>, vector<128x128xbf16>, vector<128x128xf32> -> vector<128x128xf32>
    %30 = arith.addf %29, %25 : vector<128x128xf32>
    %cst_19 = arith.constant 0.000000e+00 : f32
    %31 = vector.broadcast %cst_19 : f32 to vector<128x128xf32>
    %32 = arith.maximumf %30, %31 : vector<128x128xf32>
    %33 = vector.extract_strided_slice %16 {offsets = [0, 256], sizes = [128, 128], strides = [1, 1]} : vector<128x384xf32> to vector<128x128xf32>
    %34 = arith.truncf %32 : vector<128x128xf32> to vector<128x128xbf16>
    %c2 = arith.constant 2 : index
    %c0_20 = arith.constant 0 : index
    %c0_21 = arith.constant 0 : index
    %35 = vector.load %arg5[%c2, %c0_20, %c0_21] : memref<3x128x128xbf16, #tpu.memory_space<vmem>>, vector<1x128x128xbf16>
    %36 = vector.shape_cast %35 : vector<1x128x128xbf16> to vector<128x128xbf16>
    %cst_22 = arith.constant dense<0.000000e+00> : vector<128x128xf32>
    %37 = tpu.matmul %34, %36, %cst_22 {dimension_numbers = #tpu.dot_dimension_numbers<[1], [0], [0], [1], [0, 0, 1, 1], [], []>} : vector<128x128xbf16>, vector<128x128xbf16>, vector<128x128xf32> -> vector<128x128xf32>
    %38 = arith.addf %37, %33 : vector<128x128xf32>
    %cst_23 = arith.constant 0.000000e+00 : f32
    %39 = vector.broadcast %cst_23 : f32 to vector<128x128xf32>
    %40 = arith.maximumf %38, %39 : vector<128x128xf32>
    %41 = arith.truncf %40 : vector<128x128xf32> to vector<128x128xbf16>
    %c0_24 = arith.constant 0 : index
    %c0_25 = arith.constant 0 : index
    %42 = vector.load %arg7[%c0_24, %c0_25] : memref<128x128xbf16, #tpu.memory_space<vmem>>, vector<128x128xbf16>
    %cst_26 = arith.constant dense<0.000000e+00> : vector<128x128xf32>
    %43 = tpu.matmul %41, %42, %cst_26 {dimension_numbers = #tpu.dot_dimension_numbers<[1], [0], [0], [1], [0, 0, 1, 1], [], []>} : vector<128x128xbf16>, vector<128x128xbf16>, vector<128x128xf32> -> vector<128x128xf32>
    %c0_27 = arith.constant 0 : index
    %c0_28 = arith.constant 0 : index
    %44 = vector.load %arg8[%c0_27, %c0_28] : memref<1x128xf32, #tpu.memory_space<vmem>>, vector<1x128xf32>
    %45 = vector.broadcast %44 : vector<1x128xf32> to vector<128x128xf32>
    %46 = arith.addf %43, %45 : vector<128x128xf32>
    %c0_29 = arith.constant 0 : index
    %c0_30 = arith.constant 0 : index
    %47 = vector.load %arg9[%c0_29, %c0_30] : memref<128x128xf32, #tpu.memory_space<vmem>>, vector<128x128xf32>
    tpu.vector_store %arg9[%c0_29, %c0_30], %46 {strides = array<i32>} : memref<128x128xf32, #tpu.memory_space<vmem>>, vector<128x128xf32>,
    return
  }
  func.func @transform_0(%arg0: i32) -> (i32, i32) {
    %c0_i32 = arith.constant 0 : i32
    %c0_i32_0 = arith.constant 0 : i32
    return %arg0, %c0_i32 : i32, i32
  }
  func.func @transform_1(%arg0: i32) -> (i32, i32) {
    %c0_i32 = arith.constant 0 : i32
    %c0_i32_0 = arith.constant 0 : i32
    return %arg0, %c0_i32 : i32, i32
  }
  func.func @transform_2(%arg0: i32) -> (i32, i32) {
    %c0_i32 = arith.constant 0 : i32
    %c0_i32_0 = arith.constant 0 : i32
    %c0_i32_1 = arith.constant 0 : i32
    return %c0_i32, %c0_i32_0 : i32, i32
  }
  func.func @transform_3(%arg0: i32) -> (i32, i32) {
    %c0_i32 = arith.constant 0 : i32
    %c0_i32_0 = arith.constant 0 : i32
    %c0_i32_1 = arith.constant 0 : i32
    return %c0_i32, %c0_i32_0 : i32, i32
  }
  func.func @transform_4(%arg0: i32) -> (i32, i32, i32) {
    %c0_i32 = arith.constant 0 : i32
    %c0_i32_0 = arith.constant 0 : i32
    %c0_i32_1 = arith.constant 0 : i32
    %c0_i32_2 = arith.constant 0 : i32
    return %c0_i32, %c0_i32_0, %c0_i32_1 : i32, i32, i32
  }
  func.func @transform_5(%arg0: i32) -> (i32, i32) {
    %c0_i32 = arith.constant 0 : i32
    %c0_i32_0 = arith.constant 0 : i32
    %c0_i32_1 = arith.constant 0 : i32
    return %c0_i32, %c0_i32_0 : i32, i32
  }
  func.func @transform_6(%arg0: i32) -> (i32, i32) {
    %c0_i32 = arith.constant 0 : i32
    %c0_i32_0 = arith.constant 0 : i32
    %c0_i32_1 = arith.constant 0 : i32
    return %c0_i32, %c0_i32_0 : i32, i32
  }
  func.func @transform_7(%arg0: i32) -> (i32, i32) {
    %c0_i32 = arith.constant 0 : i32
    %c0_i32_0 = arith.constant 0 : i32
    %c0_i32_1 = arith.constant 0 : i32
    return %c0_i32, %c0_i32_0 : i32, i32
  }
  func.func @transform_8(%arg0: i32) -> (i32, i32) {
    %c0_i32 = arith.constant 0 : i32
    %c0_i32_0 = arith.constant 0 : i32
    return %arg0, %c0_i32 : i32, i32
  }
}

</mosaic_0001>

<bundles_post_ra>
// kernel: tpu_custom_call.1
= control target key start
LH: loop header
LB: loop body
LE: loop exit
PB: predicated region body
PF: predicated region fallthrough
CT: control target
= control target key end

     0   :  { %13 = vsyncpa [#allocation3], 0  ;;  %s2520_s0 = inlined_call_operand.vmem [shape: f32[128,64], index: 0, kind: input, shape index: {}]   ;;  %s2521_s1 = inlined_call_operand.vmem [shape: s32[128,1], index: 1, kind: input, shape index: {}]   ;;  %s2522_s2 = inlined_call_operand.vmem [shape: bf16[64,128], index: 2, kind: input, shape index: {}]   ;;  %s2523_s3 = inlined_call_operand.vmem [shape: f32[1,128], index: 3, kind: input, shape index: {}]   ;;  %s2524_s4 = inlined_call_operand.vmem [shape: bf16[3,128,128], index: 4, kind: input, shape index: {}]   ;;  %s2525_s5 = inlined_call_operand.hbm [shape: f32[128,384], index: 5, kind: input, shape index: {}]   ;;  %s2526_s6 = inlined_call_operand.vmem [shape: bf16[128,128], index: 6, kind: input, shape index: {}]   ;;  %s2527_s7 = inlined_call_operand.vmem [shape: f32[1,128], index: 7, kind: input, shape index: {}]   ;;  %s2528_s8 = inlined_call_operand.hbm [shape: f32[128,128], index: 8, kind: output, shape index: {}]  }
   0x1   :  { %14 = vsyncpa [#allocation4], 0  ;;  %s2029_s27 = smov [#allocation2]  }
   0x2   :  { %s30_s28 = sshll.u32 %s2029_s27, 4  ;;  %s31_s28 = int_to_ptr.vmem [resolvable:$true] %s30_s28 }
   0x3   :  { %s1993_s29 = scalar_lea.vmem %s31_s28, 6144  ;;  %p1998_p1 = scmp.lt.s32.totalorder %s31_s28, %s31_s28 }
   0x4   :  { %p1994_p0 = scmp.ne.s32.totalorder %s31_s28, %s1993_s29  ;;  %p1999_p2 = scmp.lt.s32.totalorder %s1993_s29, %s1993_s29 }
   0x6   :  { %p2000_p3 = por %p1999_p2, %p1998_p1 }
   0x8   :  { %p2001_p4 = pnand %p2000_p3, %p1994_p0 }
   0xa   :  { %2004 = shalt.err (!%p2001_p4)
}
   0xb   :  { %s2030_s30 = smov 384   ;;  %s2031_s9 = smov 24  }
   0xc   :  { %36 = dma.hbm_to_vmem [thread:$0]  %s2525_s5, 6144, %s31_s28, [#allocation3], %s2030_s30, %s2030_s30, %s2031_s9  }
   0xd   :  { %2025 = dma.done.wait [#allocation3], 6144  }
   0xe   :  { %2026 = vsyncadd [#allocation3], 4294961152  ;;  %v2032_v0 = vmov 0   ;;  %v2033_v1 = vmov 0.0   ;;  %v1949_v2 = vld [vmem:[%s2522_s2 + $0x18] sm:$0xff]   ;;  %v246_v3 = vld [vmem:[%s2521_s1] sm:$0xff] }
   0xf   :  { %1947 = vset.pattern.permute.xlu0 %v2032_v0  ;;  %1948 = vset.pattern.permute.xlu1 %v2032_v0  ;;  %v1950_v4 = vld [vmem:[%s2522_s2 + $0x10] sm:$0xff]   ;;  %v247_v5 = vld [vmem:[%s2521_s1 + $0x8] sm:$0xff]  ;;  %v249_v8 = vld [vmem:[%s2521_s1 + $0x18] sm:$0xff]  ;;  %vm108_vm0 = vcmask 523264  }
  0x10   :  { %472 = vmatprep.mubr.f32.mxu1 %v2033_v1  ;;  %1714 = vmatprep.subr.bf16.mxu0 %v1949_v2  ;;  %v248_v6 = vld [vmem:[%s2521_s1 + $0x10] sm:$0xff]  ;;  %v1951_v7 = vld [vmem:[%s2522_s2 + $0x8] sm:$0xff]   ;;  %v45_v9 = vld [vmem:[%s2520_s0] sm:$0xff] }
  0x11   :  { %265 = vperm.xlu0 %1947, %v246_v3   ;;  %1715 = vmatpush3.bf16.msra.mxu0 %v1949_v2  ;;  %v46_v10 = vld [vmem:[%s2520_s0 + $0x8] sm:$0xff]  ;;  %v250_v12 = vld [vmem:[%s2521_s1 + $0x20] sm:$0xff]  ;;  %v47_v15 = vld [vmem:[%s2520_s0 + $0x10] sm:$0xff] }
  0x12   :  { %1716 = vmatprep.subr.bf16.mxu0 %v1950_v4  ;;  %271 = vperm.xlu1 %1948, %v248_v6   ;;  %v61_v11 = vpack.c.bf16 %v46_v10, %v45_v9  ;;  %v1952_v13 = vld [vmem:[%s2522_s2] sm:$0xff]   ;;  %v251_v14 = vld [vmem:[%s2521_s1 + $0x28] sm:$0xff]  ;;  %v48_v16 = vld [vmem:[%s2520_s0 + $0x18] sm:$0xff] }
  0x13   :  { %v252_v17 = vld [vmem:[%s2521_s1 + $0x30] sm:$0xff]  ;;  %v49_v18 = vld [vmem:[%s2520_s0 + $0x20] sm:$0xff]  ;;  %v50_v19 = vld [vmem:[%s2520_s0 + $0x28] sm:$0xff]  ;;  %v62_v21 = vpack.c.bf16 %v48_v16, %v47_v15 }
  0x14   :  { %1722 = vmatprep.mubr.msk.bf16.mxu0 %vm108_vm0, %v61_v11  ;;  %v253_v20 = vld [vmem:[%s2521_s1 + $0x38] sm:$0xff]  ;;  %v406_v22 = vld [vmem:[#allocation2 + $0x170] sm:$0xff]  ;;  %v63_v23 = vpack.c.bf16 %v50_v19, %v49_v18  ;;  %v254_v24 = vld [vmem:[%s2521_s1 + $0x40] sm:$0xff] }
  0x15   :  { %268 = vperm.xlu0 %1947, %v247_v5   ;;  %1717 = vmatpush3.bf16.msra.mxu0 %v1950_v4  ;;  %v405_v25 = vld [vmem:[#allocation2 + $0x168] sm:$0xff]  ;;  %v403_v26 = vld [vmem:[#allocation2 + $0x158] sm:$0xff]  ;;  %v402_v27 = vld [vmem:[#allocation2 + $0x150] sm:$0xff] }
  0x16   :  { %1718 = vmatprep.subr.bf16.mxu0 %v1951_v7  ;;  %274 = vperm.xlu1 %1948, %v249_v8   ;;  %v255_v28 = vld [vmem:[%s2521_s1 + $0x48] sm:$0xff]  ;;  %v400_v29 = vld [vmem:[#allocation2 + $0x140] sm:$0xff]  ;;  %v51_v30 = vld [vmem:[%s2520_s0 + $0x30] sm:$0xff] }
  0x17   :  { %408 = vmatprep.subr.mxu1 %v406_v22  ;;  %v399_v31 = vld [vmem:[#allocation2 + $0x138] sm:$0xff]  ;;  %v256_v33 = vld [vmem:[%s2521_s1 + $0x50] sm:$0xff]  ;;  %v397_v34 = vld [vmem:[#allocation2 + $0x128] sm:$0xff] }
  0x18   :  { %409 = vmatpush1.msra.mxu1 %v405_v25  ;;  %v52_v32 = vld [vmem:[%s2520_s0 + $0x38] sm:$0xff]  ;;  %v53_v35 = vld [vmem:[%s2520_s0 + $0x40] sm:$0xff]  ;;  %v54_v36 = vld [vmem:[%s2520_s0 + $0x48] sm:$0xff] }
  0x19   :  { %277 = vperm.xlu0 %1947, %v250_v12   ;;  %1719 = vmatpush3.bf16.msra.mxu0 %v1951_v7  ;;  %v396_v37 = vld [vmem:[#allocation2 + $0x120] sm:$0xff]  ;;  %v257_v38 = vld [vmem:[%s2521_s1 + $0x58] sm:$0xff]  ;;  %v394_v39 = vld [vmem:[#allocation2 + $0x110] sm:$0xff]  ;;  %v64_v40 = vpack.c.bf16 %v52_v32, %v51_v30  ;;  %v65_v42 = vpack.c.bf16 %v54_v36, %v53_v35  ;;  %v262_v32 = vlaneseq  ;;  %v2034_v35 = vmov 1.0  }
  0x1a   :  { %1720 = vmatprep.subr.bf16.mxu0 %v1952_v13  ;;  %280 = vperm.xlu1 %1948, %v251_v14   ;;  %v393_v41 = vld [vmem:[#allocation2 + $0x108] sm:$0xff]  ;;  %v258_v43 = vld [vmem:[%s2521_s1 + $0x60] sm:$0xff]  ;;  %v391_v44 = vld [vmem:[#allocation2 + $0xf8] sm:$0xff] }
  0x1b   :  { %410 = vmatprep.subr.mxu1 %v403_v26  ;;  %v55_v45 = vld [vmem:[%s2520_s0 + $0x50] sm:$0xff]  ;;  %v259_v46 = vld [vmem:[%s2521_s1 + $0x68] sm:$0xff]  ;;  %v56_v48 = vld [vmem:[%s2520_s0 + $0x58] sm:$0xff] }
  0x1c   :  { %411 = vmatpush1.msra.mxu1 %v402_v27  ;;  %v390_v47 = vld [vmem:[#allocation2 + $0xf0] sm:$0xff]  ;;  %v388_v49 = vld [vmem:[#allocation2 + $0xe0] sm:$0xff]  ;;  %v407_v50 = vld [vmem:[#allocation2 + $0x178] sm:$0xff]  ;;  %v66_v60 = vpack.c.bf16 %v56_v48, %v55_v45 }
  0x1d   :  { %283 = vperm.xlu0 %1947, %v252_v17   ;;  %1721 = vmatpush3.bf16.msra.mxu0 %v1952_v13  ;;  %v57_v51 = vld [vmem:[%s2520_s0 + $0x60] sm:$0xff]  ;;  %v260_v52 = vld [vmem:[%s2521_s1 + $0x70] sm:$0xff]  ;;  %v387_v53 = vld [vmem:[#allocation2 + $0xd8] sm:$0xff] }
  0x1e   :  { %286 = vperm.xlu1 %1948, %v253_v20   ;;  %412 = vmatprep.subr.mxu1 %v400_v29  ;;  %v58_v54 = vld [vmem:[%s2520_s0 + $0x68] sm:$0xff]  ;;  %v261_v55 = vld [vmem:[%s2521_s1 + $0x78] sm:$0xff]  ;;  %v384_v57 = vld [vmem:[#allocation2 + $0xc0] sm:$0xff] }
  0x1f   :  { %413 = vmatpush1.msra.mxu1 %v399_v31  ;;  %v385_v56 = vld [vmem:[#allocation2 + $0xc8] sm:$0xff]  ;;  %v382_v58 = vld [vmem:[#allocation2 + $0xb0] sm:$0xff]  ;;  %1738 = vmatprep.subr.mxu0 %v407_v50  ;;  %v379_v61 = vld [vmem:[#allocation2 + $0x98] sm:$0xff]  ;;  %v67_v63 = vpack.c.bf16 %v58_v54, %v57_v51 }
  0x20   :  { %1723 = vmatmul.mubr.msk.bf16.vlgmr.msra.gmra.mxu0 %vm108_vm0, %v62_v21  ;;  %414 = vmatprep.subr.mxu1 %v397_v34  ;;  %v381_v59 = vld [vmem:[#allocation2 + $0xa8] sm:$0xff]  ;;  %v404_v62 = vld [vmem:[#allocation2 + $0x160] sm:$0xff]  ;;  %v378_v0 = vld [vmem:[#allocation2 + $0x90] sm:$0xff] }
  0x21   :  { %289 = vperm.xlu0 %1947, %v254_v24   ;;  %1726 = vmatprep.mubr.msk.bf16.mxu0 %vm108_vm0, %v63_v23  ;;  %v376_v2 = vld [vmem:[#allocation2 + $0x80] sm:$0xff]  ;;  %v401_v3 = vld [vmem:[#allocation2 + $0x148] sm:$0xff]  ;;  %v59_v4 = vld [vmem:[%s2520_s0 + $0x70] sm:$0xff] }
  0x22   :  { %292 = vperm.xlu1 %1948, %v255_v28   ;;  %415 = vmatpush1.msra.mxu1 %v396_v37  ;;  %v60_v5 = vld [vmem:[%s2520_s0 + $0x78] sm:$0xff]  ;;  %v373_v7 = vld [vmem:[#allocation2 + $0x68] sm:$0xff]  ;;  %v398_v8 = vld [vmem:[#allocation2 + $0x130] sm:$0xff] }
  0x23   :  { %416 = vmatprep.subr.mxu1 %v394_v39  ;;  %1739 = vmatpush3.msra.mxu0 %v407_v50  ;;  %v375_v6 = vld [vmem:[#allocation2 + $0x78] sm:$0xff]  ;;  %v372_v9 = vld [vmem:[#allocation2 + $0x60] sm:$0xff]  ;;  %v370_v10 = vld [vmem:[#allocation2 + $0x50] sm:$0xff]  ;;  %v68_v13 = vpack.c.bf16 %v60_v5, %v59_v4 }
  0x24   :  { %417 = vmatpush1.msra.mxu1 %v393_v41  ;;  %1740 = vmatprep.subr.mxu0 %v404_v62  ;;  %v395_v11 = vld [vmem:[#allocation2 + $0x118] sm:$0xff]  ;;  %v369_v12 = vld [vmem:[#allocation2 + $0x48] sm:$0xff]  ;;  %v366_v15 = vld [vmem:[#allocation2 + $0x30] sm:$0xff] }
  0x25   :  { %295 = vperm.xlu0 %1947, %v256_v33   ;;  %418 = vmatprep.subr.mxu1 %v391_v44  ;;  %v367_v14 = vld [vmem:[#allocation2 + $0x38] sm:$0xff]  ;;  %v392_v16 = vld [vmem:[#allocation2 + $0x100] sm:$0xff]  ;;  %v389_v19 = vld [vmem:[#allocation2 + $0xe8] sm:$0xff]  ;;  %v2206_v33 = vand.u32 127, %v262_v32 }
  0x26   :  { %298 = vperm.xlu1 %1948, %v257_v38   ;;  %419 = vmatpush1.msra.mxu1 %v390_v47  ;;  %v364_v17 = vld [vmem:[#allocation2 + $0x20] sm:$0xff]  ;;  %v363_v18 = vld [vmem:[#allocation2 + $0x18] sm:$0xff]  ;;  %v361_v20 = vld [vmem:[#allocation2 + $0x8] sm:$0xff] }
  0x27   :  { %420 = vmatprep.subr.mxu1 %v388_v49  ;;  %1741 = vmatpush3.msra.mxu0 %v404_v62  ;;  %v360_v21 = vld [vmem:[#allocation2] sm:$0xff]  ;;  %v386_v22 = vld [vmem:[#allocation2 + $0xd0] sm:$0xff]  ;;  %v383_v23 = vld [vmem:[#allocation2 + $0xb8] sm:$0xff] }
  0x28   :  { %1727 = vmatmul.mubr.msk.bf16.gmra.mxu0 %vm108_vm0, %v64_v40  ;;  %421 = vmatpush1.msra.mxu1 %v387_v53  ;;  %v380_v24 = vld [vmem:[#allocation2 + $0xa0] sm:$0xff]  ;;  %v377_v25 = vld [vmem:[#allocation2 + $0x88] sm:$0xff]  ;;  %v374_v26 = vld [vmem:[#allocation2 + $0x70] sm:$0xff] }
  0x29   :  { %301 = vperm.xlu0 %1947, %v258_v43   ;;  %1730 = vmatprep.mubr.msk.bf16.mxu0 %vm108_vm0, %v65_v42  ;;  %v371_v27 = vld [vmem:[#allocation2 + $0x58] sm:$0xff]  ;;  %v368_v28 = vld [vmem:[#allocation2 + $0x40] sm:$0xff]  ;;  %v365_v29 = vld [vmem:[#allocation2 + $0x28] sm:$0xff] }
  0x2a   :  { %304 = vperm.xlu1 %1948, %v259_v46   ;;  %422 = vmatprep.subr.mxu1 %v385_v56  ;;  %v362_v30 = vld [vmem:[#allocation2 + $0x10] sm:$0xff]  ;;  %v1953_v31 = vld [vmem:[%s2524_s4 + $0x38] sm:$0xff]   ;;  %v1955_v41 = vld [vmem:[%s2524_s4 + $0x28] sm:$0xff]  }
  0x2b   :  { %423 = vmatpush1.msra.mxu1 %v384_v57  ;;  %1742 = vmatprep.subr.mxu0 %v401_v3  ;;  %v1954_v38 = vld [vmem:[%s2524_s4 + $0x30] sm:$0xff]   ;;  %v1956_v44 = vld [vmem:[%s2524_s4 + $0x20] sm:$0xff]   ;;  %v1957_v47 = vld [vmem:[%s2524_s4 + $0x18] sm:$0xff]  }
  0x2c   :  { %424 = vmatprep.subr.mxu1 %v382_v58  ;;  %1743 = vmatpush3.msra.mxu0 %v401_v3  ;;  %v1958_v50 = vld [vmem:[%s2524_s4 + $0x10] sm:$0xff]   ;;  %v1959_v53 = vld [vmem:[%s2524_s4 + $0x8] sm:$0xff]   ;;  %v1960_v56 = vld [vmem:[%s2524_s4] sm:$0xff]  }
  0x2d   :  { %307 = vperm.xlu0 %1947, %v260_v52   ;;  %425 = vmatpush1.msra.mxu1 %v381_v59 }
  0x2e   :  { %310 = vperm.xlu1 %1948, %v261_v55   ;;  %426 = vmatprep.subr.mxu1 %v379_v61 }
  0x2f   :  { %427 = vmatpush1.msra.mxu1 %v378_v0  ;;  %1744 = vmatprep.subr.mxu0 %v398_v8 }
  0x30   :  { %1731 = vmatmul.mubr.msk.bf16.gmra.mxu0 %vm108_vm0, %v66_v60  ;;  %428 = vmatprep.subr.mxu1 %v376_v2  ;;  %v1480_v60 = vld [vmem:[%s2523_s3] ss:$0 sm:$0xff] }
  0x31   :  { %1734 = vmatprep.mubr.msk.bf16.mxu0 %vm108_vm0, %v67_v63  ;;  %429 = vmatpush1.msra.mxu1 %v375_v6 }
  0x32   :  { %430 = vmatprep.subr.mxu1 %v373_v7  ;;  %1745 = vmatpush3.msra.mxu0 %v398_v8 }
  0x33   :  { %431 = vmatpush1.msra.mxu1 %v372_v9  ;;  %1746 = vmatprep.subr.mxu0 %v395_v11 }
  0x34   :  { %432 = vmatprep.subr.mxu1 %v370_v10  ;;  %1747 = vmatpush3.msra.mxu0 %v395_v11 }
  0x35   :  { %433 = vmatpush1.msra.mxu1 %v369_v12  ;;  %1748 = vmatprep.subr.mxu0 %v392_v16 }
  0x36   :  { %434 = vmatprep.subr.mxu1 %v367_v14  ;;  %1749 = vmatpush3.msra.mxu0 %v392_v16 }
  0x37   :  { %435 = vmatpush1.msra.mxu1 %v366_v15  ;;  %1750 = vmatprep.subr.mxu0 %v389_v19 }
  0x38   :  { %1735 = vmatmul.mubr.msk.bf16.gmra.mxu0 %vm108_vm0, %v68_v13  ;;  %436 = vmatprep.subr.mxu1 %v364_v17 }
  0x39   :  { %437 = vmatpush1.msra.mxu1 %v363_v18  ;;  %1751 = vmatpush3.msra.mxu0 %v389_v19 }
  0x3a   :  { %438 = vmatprep.subr.mxu1 %v361_v20  ;;  %1752 = vmatprep.subr.mxu0 %v386_v22 }
  0x3b   :  { %439 = vmatpush1.msra.mxu1 %v360_v21  ;;  %1753 = vmatpush3.msra.mxu0 %v386_v22 }
  0x3c   :  { %1754 = vmatprep.subr.mxu0 %v383_v23 }
  0x3d   :  { %1755 = vmatpush3.msra.mxu0 %v383_v23 }
  0x3e   :  { %1756 = vmatprep.subr.mxu0 %v380_v24 }
  0x3f   :  { %1757 = vmatpush3.msra.mxu0 %v380_v24 }
  0x40   :  { %1758 = vmatprep.subr.mxu0 %v377_v25 }
  0x41   :  { %1759 = vmatpush3.msra.mxu0 %v377_v25 }
  0x42   :  { %1760 = vmatprep.subr.mxu0 %v374_v26 }
  0x43   :  { %1761 = vmatpush3.msra.mxu0 %v374_v26 }
  0x44   :  { %1762 = vmatprep.subr.mxu0 %v371_v27 }
  0x45   :  { %1763 = vmatpush3.msra.mxu0 %v371_v27 }
  0x46   :  { %1764 = vmatprep.subr.mxu0 %v368_v28 }
  0x47   :  { %1765 = vmatpush3.msra.mxu0 %v368_v28 }
  0x48   :  { %1766 = vmatprep.subr.mxu0 %v365_v29 }
  0x49   :  { %1767 = vmatpush3.msra.mxu0 %v365_v29 }
  0x4a   :  { %1768 = vmatprep.subr.mxu0 %v362_v30 }
  0x4b   :  { %1769 = vmatpush3.msra.mxu0 %v362_v30 }
  0x4c   :  { %1794 = vmatprep.subr.bf16.mxu0 %v1953_v31 }
  0x8c   :  { %v266_v34 = vpop.permute.xlu0 %265 }
  0x8d   :  { %vm312_vm1 = vcmp.eq.s32.totalorder %v2206_v33, %v266_v34  ;;  %v272_v36 = vpop.permute.xlu1 %271 }
  0x8e   :  { %1509 = vmatmul.mubr.msk.f32.vlgmr.msra.gmra.mxu1 %vm312_vm1, %v2034_v35  ;;  %1770 = vmatprep.mubr.msk.f32.mxu0 %vm312_vm1, %v2034_v35  ;;  %vm314_vm3 = vcmp.eq.s32.totalorder %v2206_v33, %v272_v36 }
  0x8f   :  { %478 = vmatprep.mubr.f32.mxu1 %v2033_v1 }
  0x90   :  { %v269_v37 = vpop.permute.xlu0 %268 }
  0x91   :  { %vm313_vm2 = vcmp.eq.s32.totalorder %v2206_v33, %v269_v37  ;;  %v275_v39 = vpop.permute.xlu1 %274 }
  0x92   :  { %1510 = vmatmul.mubr.msk.f32.gmra.mxu1 %vm313_vm2, %v2034_v35  ;;  %1771 = vmatmul.mubr.msk.f32.vlgmr.msra.gmra.mxu0 %vm313_vm2, %v2034_v35  ;;  %vm315_vm4 = vcmp.eq.s32.totalorder %v2206_v33, %v275_v39 }
  0x93   :  { %484 = vmatprep.mubr.f32.mxu1 %v2033_v1  ;;  %1773 = vmatprep.mubr.msk.f32.mxu0 %vm314_vm3, %v2034_v35 }
  0x94   :  { %v278_v40 = vpop.permute.xlu0 %277  ;;  %1795 = vmatpush3.bf16.msra.mxu0 %v1953_v31  ;;  %v1961_v31 = vld [vmem:[%s2524_s4 + $0x78] sm:$0xff]  }
  0x95   :  { %1796 = vmatprep.subr.bf16.mxu0 %v1954_v38  ;;  %vm316_vm5 = vcmp.eq.s32.totalorder %v2206_v33, %v278_v40  ;;  %v281_v42 = vpop.permute.xlu1 %280  ;;  %1826 = vmatprep.subr.bf16.mxu1 %v1961_v31 }
  0x96   :  { %1511 = vmatmul.mubr.msk.f32.gmra.mxu1 %vm314_vm3, %v2034_v35  ;;  %1774 = vmatmul.mubr.msk.f32.gmra.mxu0 %vm315_vm4, %v2034_v35  ;;  %vm317_vm6 = vcmp.eq.s32.totalorder %v2206_v33, %v281_v42 }
  0x97   :  { %490 = vmatprep.mubr.f32.mxu1 %v2033_v1  ;;  %1776 = vmatprep.mubr.msk.f32.mxu0 %vm316_vm5, %v2034_v35 }
  0x98   :  { %v284_v43 = vpop.permute.xlu0 %283  ;;  %1797 = vmatpush3.bf16.msra.mxu0 %v1954_v38  ;;  %1827 = vmatpush3.bf16.msra.mxu1 %v1961_v31 }
  0x99   :  { %1798 = vmatprep.subr.bf16.mxu0 %v1955_v41  ;;  %vm318_vm7 = vcmp.eq.s32.totalorder %v2206_v33, %v284_v43  ;;  %v287_v45 = vpop.permute.xlu1 %286 }
  0x9a   :  { %1512 = vmatmul.mubr.msk.f32.gmra.mxu1 %vm315_vm4, %v2034_v35  ;;  %1777 = vmatmul.mubr.msk.f32.gmra.mxu0 %vm317_vm6, %v2034_v35  ;;  %vm319_vm8 = vcmp.eq.s32.totalorder %v2206_v33, %v287_v45 }
  0x9b   :  { %496 = vmatprep.mubr.f32.mxu1 %v2033_v1  ;;  %1779 = vmatprep.mubr.msk.f32.mxu0 %vm318_vm7, %v2034_v35 }
  0x9c   :  { %v290_v46 = vpop.permute.xlu0 %289  ;;  %1799 = vmatpush3.bf16.msra.mxu0 %v1955_v41 }
  0x9d   :  { %1800 = vmatprep.subr.bf16.mxu0 %v1956_v44  ;;  %vm320_vm9 = vcmp.eq.s32.totalorder %v2206_v33, %v290_v46  ;;  %v293_v48 = vpop.permute.xlu1 %292  ;;  %v1962_v46 = vld [vmem:[%s2524_s4 + $0x70] sm:$0xff]  }
  0x9e   :  { %1513 = vmatmul.mubr.msk.f32.gmra.mxu1 %vm316_vm5, %v2034_v35  ;;  %1780 = vmatmul.mubr.msk.f32.gmra.mxu0 %vm319_vm8, %v2034_v35  ;;  %vm321_vm10 = vcmp.eq.s32.totalorder %v2206_v33, %v293_v48 }
  0x9f   :  { %502 = vmatprep.mubr.f32.mxu1 %v2033_v1  ;;  %1782 = vmatprep.mubr.msk.f32.mxu0 %vm320_vm9, %v2034_v35 }
  0xa0   :  { %v296_v49 = vpop.permute.xlu0 %295  ;;  %1801 = vmatpush3.bf16.msra.mxu0 %v1956_v44  ;;  %1828 = vmatprep.subr.bf16.mxu1 %v1962_v46 }
  0xa1   :  { %1802 = vmatprep.subr.bf16.mxu0 %v1957_v47  ;;  %vm322_vm11 = vcmp.eq.s32.totalorder %v2206_v33, %v296_v49  ;;  %v299_v51 = vpop.permute.xlu1 %298  ;;  %1829 = vmatpush3.bf16.msra.mxu1 %v1962_v46 }
  0xa2   :  { %1514 = vmatmul.mubr.msk.f32.gmra.mxu1 %vm317_vm6, %v2034_v35  ;;  %1783 = vmatmul.mubr.msk.f32.gmra.mxu0 %vm321_vm10, %v2034_v35  ;;  %vm323_vm12 = vcmp.eq.s32.totalorder %v2206_v33, %v299_v51 }
  0xa3   :  { %508 = vmatprep.mubr.f32.mxu1 %v2033_v1  ;;  %1785 = vmatprep.mubr.msk.f32.mxu0 %vm322_vm11, %v2034_v35 }
  0xa4   :  { %v302_v52 = vpop.permute.xlu0 %301  ;;  %1803 = vmatpush3.bf16.msra.mxu0 %v1957_v47 }
  0xa5   :  { %1804 = vmatprep.subr.bf16.mxu0 %v1958_v50  ;;  %vm324_vm13 = vcmp.eq.s32.totalorder %v2206_v33, %v302_v52  ;;  %v305_v54 = vpop.permute.xlu1 %304 }
  0xa6   :  { %1515 = vmatmul.mubr.msk.f32.gmra.mxu1 %vm318_vm7, %v2034_v35  ;;  %1786 = vmatmul.mubr.msk.f32.gmra.mxu0 %vm323_vm12, %v2034_v35  ;;  %vm325_vm14 = vcmp.eq.s32.totalorder %v2206_v33, %v305_v54  ;;  %v1964_v54 = vld [vmem:[%s2524_s4 + $0x60] sm:$0xff]  }
  0xa7   :  { %514 = vmatprep.mubr.f32.mxu1 %v2033_v1  ;;  %1788 = vmatprep.mubr.msk.f32.mxu0 %vm324_vm13, %v2034_v35 }
  0xa8   :  { %v308_v55 = vpop.permute.xlu0 %307  ;;  %1805 = vmatpush3.bf16.msra.mxu0 %v1958_v50 }
  0xa9   :  { %1806 = vmatprep.subr.bf16.mxu0 %v1959_v53  ;;  %vm326_vm15 = vcmp.eq.s32.totalorder %v2206_v33, %v308_v55  ;;  %v311_v57 = vpop.permute.xlu1 %310  ;;  %v1965_v55 = vld [vmem:[%s2524_s4 + $0x58] sm:$0xff]  }
  0xaa   :  { %1516 = vmatmul.mubr.msk.f32.gmra.mxu1 %vm319_vm8, %v2034_v35  ;;  %1789 = vmatmul.mubr.msk.f32.gmra.mxu0 %vm325_vm14, %v2034_v35  ;;  %vm327_vm0 = vcmp.eq.s32.totalorder %v2206_v33, %v311_v57  ;;  %v1967_v57 = vld [vmem:[%s2524_s4 + $0x48] sm:$0xff]  }
  0xab   :  { %520 = vmatprep.mubr.f32.mxu1 %v2033_v1  ;;  %1791 = vmatprep.mubr.msk.f32.mxu0 %vm326_vm15, %v2034_v35 }
  0xac   :  { %1807 = vmatpush3.bf16.msra.mxu0 %v1959_v53  ;;  %v1963_v53 = vld [vmem:[%s2524_s4 + $0x68] sm:$0xff]  }
  0xad   :  { %1808 = vmatprep.subr.bf16.mxu0 %v1960_v56  ;;  %1830 = vmatprep.subr.bf16.mxu1 %v1963_v53 }
  0xae   :  { %1517 = vmatmul.mubr.msk.f32.gmra.mxu1 %vm320_vm9, %v2034_v35  ;;  %1792 = vmatmul.mubr.msk.f32.gmra.mxu0 %vm327_vm0, %v2034_v35 }
  0xaf   :  { %526 = vmatprep.mubr.f32.mxu1 %v2033_v1  ;;  %1831 = vmatpush3.bf16.msra.mxu1 %v1963_v53 }
  0xb0   :  { %1809 = vmatpush3.bf16.msra.mxu0 %v1960_v56  ;;  %1832 = vmatprep.subr.bf16.mxu1 %v1964_v54  ;;  %v1966_v56 = vld [vmem:[%s2524_s4 + $0x50] sm:$0xff]  }
  0xb2   :  { %1518 = vmatmul.mubr.msk.f32.gmra.mxu1 %vm321_vm10, %v2034_v35 }
  0xb3   :  { %532 = vmatprep.mubr.f32.mxu1 %v2033_v1  ;;  %1833 = vmatpush3.bf16.msra.mxu1 %v1964_v54 }
  0xb4   :  { %1834 = vmatprep.subr.bf16.mxu1 %v1965_v55 }
  0xb6   :  { %1519 = vmatmul.mubr.msk.f32.gmra.mxu1 %vm322_vm11, %v2034_v35 }
  0xb7   :  { %538 = vmatprep.mubr.f32.mxu1 %v2033_v1  ;;  %1835 = vmatpush3.bf16.msra.mxu1 %v1965_v55 }
  0xb8   :  { %1836 = vmatprep.subr.bf16.mxu1 %v1966_v56 }
  0xba   :  { %1520 = vmatmul.mubr.msk.f32.gmra.mxu1 %vm323_vm12, %v2034_v35 }
  0xbb   :  { %544 = vmatprep.mubr.f32.mxu1 %v2033_v1  ;;  %1837 = vmatpush3.bf16.msra.mxu1 %v1966_v56 }
  0xbc   :  { %1838 = vmatprep.subr.bf16.mxu1 %v1967_v57 }
  0xbe   :  { %1521 = vmatmul.mubr.msk.f32.gmra.mxu1 %vm324_vm13, %v2034_v35 }
  0xbf   :  { %550 = vmatprep.mubr.f32.mxu1 %v2033_v1  ;;  %1839 = vmatpush3.bf16.msra.mxu1 %v1967_v57 }
  0xc2   :  { %1522 = vmatmul.mubr.msk.f32.gmra.mxu1 %vm325_vm14, %v2034_v35 }
  0xc3   :  { %556 = vmatprep.mubr.f32.mxu1 %v2033_v1 }
  0xc6   :  { %1523 = vmatmul.mubr.msk.f32.gmra.mxu1 %vm326_vm15, %v2034_v35 }
  0xc7   :  { %562 = vmatprep.mubr.f32.mxu1 %v2033_v1 }
  0xca   :  { %1524 = vmatmul.mubr.msk.f32.gmra.mxu1 %vm327_vm0, %v2034_v35 }
  0xe0   :  { %v1724_v58 = vpop.f32.mrf.mxu0 }
  0xe1   :  { %v176_v0 = vadd.f32 %v1724_v58, %v1480_v60  ;;  %v1968_v58 = vld [vmem:[%s2524_s4 + $0x40] sm:$0xff]  }
  0xe2   :  { %v167_v59 = vpop.f32.mrf.mxu0  ;;  %1840 = vmatprep.subr.bf16.mxu1 %v1968_v58 }
  0xe3   :  { %v168_v62 = vadd.f32 %v1480_v60, %v167_v59  ;;  %v232_v7 = vmax.f32 %v176_v0, 0.0  ;;  %1841 = vmatpush3.bf16.msra.mxu1 %v1968_v58 }
  0xe4   :  { %v1725_v61 = vpop.f32.mrf.mxu0 }
  0xe5   :  { %v179_v63 = vadd.f32 %v1725_v61, %v1480_v60  ;;  %v230_v6 = vmax.f32 %v168_v62, 0.0  ;;  %v1970_v61 = vld [vmem:[%s2524_s4 + $0xb0] sm:$0xff]  }
  0xe6   :  { %v170_v2 = vpop.f32.mrf.mxu0 }
  0xe7   :  { %v171_v3 = vadd.f32 %v1480_v60, %v170_v2  ;;  %v233_v4 = vmax.f32 %v179_v63, 0.0  ;;  %v1971_v63 = vld [vmem:[%s2524_s4 + $0xa8] sm:$0xff]   ;;  %v1972_v2 = vld [vmem:[%s2524_s4 + $0xa0] sm:$0xff]  }
  0xe8   :  { %v1728_v5 = vpop.f32.mrf.mxu0 }
  0xe9   :  { %v231_v1 = vmax.f32 %v171_v3, 0.0  ;;  %v715_v10 = vpack.c.bf16 %v233_v4, %v232_v7  ;;  %v192_v14 = vadd.f32 %v1728_v5, %v1480_v60  ;;  %v1973_v4 = vld [vmem:[%s2524_s4 + $0x98] sm:$0xff]  }
  0xea   :  { %v183_v8 = vpop.f32.mrf.mxu0 }
  0xeb   :  { %v714_v9 = vpack.c.bf16 %v231_v1, %v230_v6  ;;  %v184_v12 = vadd.f32 %v1480_v60, %v183_v8  ;;  %v236_v21 = vmax.f32 %v192_v14, 0.0 }
  0xec   :  { %v1729_v11 = vpop.f32.mrf.mxu0 }
  0xed   :  { %v195_v13 = vadd.f32 %v1729_v11, %v1480_v60  ;;  %1810 = vmatprep.mubr.bf16.mxu0 %v714_v9  ;;  %v234_v19 = vmax.f32 %v184_v12, 0.0 }
  0xee   :  { %v186_v15 = vpop.f32.mrf.mxu0  ;;  %1811 = vmatmul.mubr.bf16.vlgmr.msra.gmra.mxu0 %v715_v10 }
  0xef   :  { %v187_v16 = vadd.f32 %v1480_v60, %v186_v15  ;;  %v237_v17 = vmax.f32 %v195_v13, 0.0 }
  0xf0   :  { %v1732_v18 = vpop.f32.mrf.mxu0 }
  0xf1   :  { %v235_v20 = vmax.f32 %v187_v16, 0.0  ;;  %v717_v24 = vpack.c.bf16 %v237_v17, %v236_v21  ;;  %v208_v28 = vadd.f32 %v1732_v18, %v1480_v60 }
  0xf2   :  { %v199_v22 = vpop.f32.mrf.mxu0 }
  0xf3   :  { %v716_v23 = vpack.c.bf16 %v235_v20, %v234_v19  ;;  %v200_v26 = vadd.f32 %v1480_v60, %v199_v22  ;;  %v240_v36 = vmax.f32 %v208_v28, 0.0 }
  0xf4   :  { %v1733_v25 = vpop.f32.mrf.mxu0 }
  0xf5   :  { %v211_v27 = vadd.f32 %v1733_v25, %v1480_v60  ;;  %1814 = vmatprep.mubr.bf16.mxu0 %v716_v23  ;;  %v238_v34 = vmax.f32 %v200_v26, 0.0 }
  0xf6   :  { %v202_v29 = vpop.f32.mrf.mxu0  ;;  %1815 = vmatmul.mubr.bf16.gmra.mxu0 %v717_v24 }
  0xf7   :  { %v203_v30 = vadd.f32 %v1480_v60, %v202_v29  ;;  %v241_v32 = vmax.f32 %v211_v27, 0.0 }
  0xf8   :  { %v1736_v33 = vpop.f32.mrf.mxu0 }
  0xf9   :  { %v239_v35 = vmax.f32 %v203_v30, 0.0  ;;  %v719_v39 = vpack.c.bf16 %v241_v32, %v240_v36  ;;  %v224_v43 = vadd.f32 %v1736_v33, %v1480_v60 }
  0xfa   :  { %v215_v37 = vpop.f32.mrf.mxu0 }
  0xfb   :  { %v718_v38 = vpack.c.bf16 %v239_v35, %v238_v34  ;;  %v216_v41 = vadd.f32 %v1480_v60, %v215_v37  ;;  %v244_v50 = vmax.f32 %v224_v43, 0.0 }
  0xfc   :  { %v1737_v40 = vpop.f32.mrf.mxu0 }
  0xfd   :  { %v227_v42 = vadd.f32 %v1737_v40, %v1480_v60  ;;  %1818 = vmatprep.mubr.bf16.mxu0 %v718_v38  ;;  %v242_v48 = vmax.f32 %v216_v41, 0.0 }
  0xfe   :  { %v218_v44 = vpop.f32.mrf.mxu0  ;;  %1819 = vmatmul.mubr.bf16.gmra.mxu0 %v719_v39 }
  0xff   :  { %v219_v45 = vadd.f32 %v1480_v60, %v218_v44  ;;  %v245_v47 = vmax.f32 %v227_v42, 0.0  ;;  %v1969_v60 = vld [vmem:[%s2524_s4 + $0xb8] sm:$0xff]  }
 0x100   :  { %1858 = vmatprep.subr.bf16.mxu0 %v1969_v60 }
 0x101   :  { %v243_v49 = vmax.f32 %v219_v45, 0.0  ;;  %v721_v52 = vpack.c.bf16 %v245_v47, %v244_v50  ;;  %1859 = vmatpush3.bf16.msra.mxu0 %v1969_v60 }
 0x102   :  { %1860 = vmatprep.subr.bf16.mxu0 %v1970_v61 }
 0x103   :  { %v720_v51 = vpack.c.bf16 %v243_v49, %v242_v48 }
 0x105   :  { %1822 = vmatprep.mubr.bf16.mxu0 %v720_v51  ;;  %1861 = vmatpush3.bf16.msra.mxu0 %v1970_v61 }
 0x106   :  { %1823 = vmatmul.mubr.bf16.gmra.mxu0 %v721_v52  ;;  %1862 = vmatprep.subr.bf16.mxu0 %v1971_v63 }
 0x109   :  { %1863 = vmatpush3.bf16.msra.mxu0 %v1971_v63 }
 0x10a   :  { %1864 = vmatprep.subr.bf16.mxu0 %v1972_v2 }
 0x10d   :  { %1865 = vmatpush3.bf16.msra.mxu0 %v1972_v2 }
 0x10e   :  { %1866 = vmatprep.subr.bf16.mxu0 %v1973_v4 }
 0x111   :  { %1867 = vmatpush3.bf16.msra.mxu0 %v1973_v4 }
 0x14e   :  { %v474_v59 = vpop.f32.mrf.mxu1 }
 0x150   :  { %v2373_v62 = vpop.f32.mrf.mxu1 }
 0x152   :  { %v480_v0 = vpop.f32.mrf.mxu1  ;;  %v2390_v8 = vpop.f32.mrf.mxu0 }
 0x154   :  { %v2381_v3 = vpop.f32.mrf.mxu1  ;;  %v2392_v10 = vpop.f32.mrf.mxu0 }
 0x156   :  { %v486_v5 = vpop.f32.mrf.mxu1  ;;  %v2396_v12 = vpop.f32.mrf.mxu0 }
 0x158   :  { %v2386_v6 = vpop.f32.mrf.mxu1  ;;  %v2398_v14 = vpop.f32.mrf.mxu0 }
 0x15a   :  { %v492_v1 = vpop.f32.mrf.mxu1  ;;  %v2402_v16 = vpop.f32.mrf.mxu0 }
 0x15c   :  { %v2388_v7 = vpop.f32.mrf.mxu1  ;;  %v2404_v18 = vpop.f32.mrf.mxu0 }
 0x15e   :  { %v498_v9 = vpop.f32.mrf.mxu1  ;;  %v2408_v20 = vpop.f32.mrf.mxu0 }
 0x160   :  { %v2394_v11 = vpop.f32.mrf.mxu1  ;;  %v2410_v22 = vpop.f32.mrf.mxu0 }
 0x162   :  { %v504_v13 = vpop.f32.mrf.mxu1  ;;  %v2414_v24 = vpop.f32.mrf.mxu0 }
 0x164   :  { %v2400_v15 = vpop.f32.mrf.mxu1  ;;  %v2416_v26 = vpop.f32.mrf.mxu0 }
 0x166   :  { %v510_v17 = vpop.f32.mrf.mxu1  ;;  %v2420_v28 = vpop.f32.mrf.mxu0 }
 0x168   :  { %v2406_v19 = vpop.f32.mrf.mxu1  ;;  %v2422_v30 = vpop.f32.mrf.mxu0 }
 0x16a   :  { %v516_v21 = vpop.f32.mrf.mxu1  ;;  %v2426_v32 = vpop.f32.mrf.mxu0 }
 0x16c   :  { %v2412_v23 = vpop.f32.mrf.mxu1  ;;  %v2428_v34 = vpop.f32.mrf.mxu0 }
 0x16e   :  { %v522_v25 = vpop.f32.mrf.mxu1  ;;  %v2432_v36 = vpop.f32.mrf.mxu0 }
 0x170   :  { %v2418_v27 = vpop.f32.mrf.mxu1  ;;  %v2434_v38 = vpop.f32.mrf.mxu0 }
 0x172   :  { %v528_v29 = vpop.f32.mrf.mxu1 }
 0x174   :  { %v2424_v31 = vpop.f32.mrf.mxu1 }
 0x176   :  { %v534_v33 = vpop.f32.mrf.mxu1 }
 0x178   :  { %v2430_v35 = vpop.f32.mrf.mxu1 }
 0x17a   :  { %v540_v37 = vpop.f32.mrf.mxu1 }
 0x17c   :  { %v2436_v39 = vpop.f32.mrf.mxu1 }
 0x17e   :  { %v546_v42 = vpop.f32.mrf.mxu1 }
 0x180   :  { %v2438_v49 = vpop.f32.mrf.mxu1 }
 0x182   :  { %v552_v57 = vpop.f32.mrf.mxu1 }
 0x1ae   :  { %v1812_v40 = vpop.f32.mrf.mxu0 }
 0x1af   :  { %v829_v46 = vadd.f32 %v1812_v40, %v486_v5 }
 0x1b0   :  { %v820_v41 = vpop.f32.mrf.mxu0 }
 0x1b1   :  { %v821_v44 = vadd.f32 %v820_v41, %v474_v59  ;;  %v885_v54 = vmax.f32 %v829_v46, 0.0 }
 0x1b2   :  { %v1813_v43 = vpop.f32.mrf.mxu0 }
 0x1b3   :  { %v832_v45 = vadd.f32 %v1813_v43, %v492_v1  ;;  %v883_v52 = vmax.f32 %v821_v44, 0.0 }
 0x1b4   :  { %v823_v47 = vpop.f32.mrf.mxu0 }
 0x1b5   :  { %v824_v48 = vadd.f32 %v823_v47, %v480_v0  ;;  %v886_v50 = vmax.f32 %v832_v45, 0.0  ;;  %v2440_v0 = vpop.f32.mrf.mxu1 }
 0x1b6   :  { %v1816_v51 = vpop.f32.mrf.mxu0 }
 0x1b7   :  { %v884_v53 = vmax.f32 %v824_v48, 0.0  ;;  %v900_v58 = vpack.c.bf16 %v886_v50, %v885_v54  ;;  %v845_v59 = vadd.f32 %v1816_v51, %v510_v17  ;;  %v558_v46 = vpop.f32.mrf.mxu1 }
 0x1b8   :  { %v836_v55 = vpop.f32.mrf.mxu0 }
 0x1b9   :  { %v899_v56 = vpack.c.bf16 %v884_v53, %v883_v52  ;;  %v837_v61 = vadd.f32 %v836_v55, %v498_v9  ;;  %v889_v43 = vmax.f32 %v845_v59, 0.0 }
 0x1ba   :  { %v1817_v60 = vpop.f32.mrf.mxu0 }
 0x1bb   :  { %v848_v63 = vadd.f32 %v1817_v60, %v516_v21  ;;  %1842 = vmatprep.mubr.bf16.mxu1 %v899_v56  ;;  %v887_v40 = vmax.f32 %v837_v61, 0.0 }
 0x1bc   :  { %v839_v2 = vpop.f32.mrf.mxu0  ;;  %1843 = vmatmul.mubr.bf16.vlgmr.msra.gmra.mxu1 %v900_v58 }
 0x1bd   :  { %v840_v4 = vadd.f32 %v839_v2, %v504_v13  ;;  %v890_v5 = vmax.f32 %v848_v63, 0.0  ;;  %v2442_v13 = vpop.f32.mrf.mxu1 }
 0x1be   :  { %v1820_v1 = vpop.f32.mrf.mxu0 }
 0x1bf   :  { %v888_v41 = vmax.f32 %v840_v4, 0.0  ;;  %v902_v47 = vpack.c.bf16 %v890_v5, %v889_v43  ;;  %v861_v21 = vadd.f32 %v1820_v1, %v534_v33  ;;  %v564_v61 = vpop.f32.mrf.mxu1 }
 0x1c0   :  { %v852_v44 = vpop.f32.mrf.mxu0 }
 0x1c1   :  { %v901_v45 = vpack.c.bf16 %v888_v41, %v887_v40  ;;  %v853_v50 = vadd.f32 %v852_v44, %v522_v25  ;;  %v893_v56 = vmax.f32 %v861_v21, 0.0  ;;  %v1974_v44 = vld [vmem:[%s2524_s4 + $0x90] sm:$0xff]  }
 0x1c2   :  { %v1821_v48 = vpop.f32.mrf.mxu0  ;;  %1868 = vmatprep.subr.bf16.mxu0 %v1974_v44 }
 0x1c3   :  { %v864_v9 = vadd.f32 %v1821_v48, %v540_v37  ;;  %1846 = vmatprep.mubr.bf16.mxu1 %v901_v45  ;;  %v891_v54 = vmax.f32 %v853_v50, 0.0  ;;  %1869 = vmatpush3.bf16.msra.mxu0 %v1974_v44  ;;  %v1977_v45 = vld [vmem:[%s2526_s6 + $0x38] sm:$0xff]   ;;  %v1980_v48 = vld [vmem:[%s2526_s6 + $0x20] sm:$0xff]  }
 0x1c4   :  { %v855_v17 = vpop.f32.mrf.mxu0  ;;  %1847 = vmatmul.mubr.bf16.gmra.mxu1 %v902_v47  ;;  %1922 = vmatprep.subr.bf16.mxu1 %v1977_v45  ;;  %v1979_v47 = vld [vmem:[%s2526_s6 + $0x28] sm:$0xff]   ;;  %v2468_v50 = vld [vmem:[%s2526_s6 + $0x18] sm:$0xff]  }
 0x1c5   :  { %v856_v51 = vadd.f32 %v855_v17, %v528_v29  ;;  %v894_v52 = vmax.f32 %v864_v9, 0.0  ;;  %1930 = vmatpush3.bf16.msra.mxu1 %v1977_v45  ;;  %v566_v9 = vpop.f32.mrf.mxu1 }
 0x1c6   :  { %v1824_v53 = vpop.f32.mrf.mxu0 }
 0x1c7   :  { %v892_v55 = vmax.f32 %v856_v51, 0.0  ;;  %v904_v63 = vpack.c.bf16 %v894_v52, %v893_v56  ;;  %v877_v37 = vadd.f32 %v1824_v53, %v558_v46  ;;  %v1978_v46 = vld [vmem:[%s2526_s6 + $0x30] sm:$0xff]  }
 0x1c8   :  { %v868_v58 = vpop.f32.mrf.mxu0  ;;  %1923 = vmatprep.subr.bf16.mxu1 %v1978_v46 }
 0x1c9   :  { %v903_v60 = vpack.c.bf16 %v892_v55, %v891_v54  ;;  %v869_v2 = vadd.f32 %v868_v58, %v546_v42  ;;  %v897_v40 = vmax.f32 %v877_v37, 0.0  ;;  %v1975_v42 = vld [vmem:[%s2524_s4 + $0x88] sm:$0xff]   ;;  %1931 = vmatpush3.bf16.msra.mxu1 %v1978_v46 }
 0x1ca   :  { %v1825_v59 = vpop.f32.mrf.mxu0  ;;  %1870 = vmatprep.subr.bf16.mxu0 %v1975_v42  ;;  %1924 = vmatprep.subr.bf16.mxu1 %v1979_v47 }
 0x1cb   :  { %v880_v25 = vadd.f32 %v1825_v59, %v564_v61  ;;  %1850 = vmatprep.mubr.bf16.mxu1 %v903_v60  ;;  %v895_v5 = vmax.f32 %v869_v2, 0.0  ;;  %1871 = vmatpush3.bf16.msra.mxu0 %v1975_v42 }
 0x1cc   :  { %v871_v33 = vpop.f32.mrf.mxu0  ;;  %1851 = vmatmul.mubr.bf16.gmra.mxu1 %v904_v63 }
 0x1cd   :  { %v872_v4 = vadd.f32 %v871_v33, %v552_v57  ;;  %v898_v29 = vmax.f32 %v880_v25, 0.0  ;;  %v1976_v57 = vld [vmem:[%s2524_s4 + $0x80] sm:$0xff]   ;;  %1932 = vmatpush3.bf16.msra.mxu1 %v1979_v47 }
 0x1ce   :  { %1872 = vmatprep.subr.bf16.mxu0 %v1976_v57  ;;  %1925 = vmatprep.subr.bf16.mxu1 %v1980_v48 }
 0x1cf   :  { %v896_v1 = vmax.f32 %v872_v4, 0.0  ;;  %v906_v43 = vpack.c.bf16 %v898_v29, %v897_v40  ;;  %1873 = vmatpush3.bf16.msra.mxu0 %v1976_v57 }
 0x1d0   :  { %1890 = vmatprep.subr.bf16.mxu0 %v1977_v45 }
 0x1d1   :  { %v905_v41 = vpack.c.bf16 %v896_v1, %v895_v5  ;;  %1933 = vmatpush3.bf16.msra.mxu1 %v1980_v48 }
 0x1d2   :  { %1926 = vmatprep.subr.bf16.mxu1 %v2468_v50 }
 0x1d3   :  { %1854 = vmatprep.mubr.bf16.mxu1 %v905_v41 }
 0x1d4   :  { %1855 = vmatmul.mubr.bf16.gmra.mxu1 %v906_v43 }
 0x1d5   :  { %1934 = vmatpush3.bf16.msra.mxu1 %v2468_v50 }
 0x27c   :  { %v1844_v21 = vpop.f32.mrf.mxu1 }
 0x27d   :  { %v1015_v54 = vadd.f32 %v1844_v21, %v2386_v6 }
 0x27e   :  { %v1006_v17 = vpop.f32.mrf.mxu1 }
 0x27f   :  { %v1007_v52 = vadd.f32 %v1006_v17, %v2373_v62  ;;  %v1071_v59 = vmax.f32 %v1015_v54, 0.0 }
 0x280   :  { %v1845_v51 = vpop.f32.mrf.mxu1 }
 0x281   :  { %v1018_v53 = vadd.f32 %v1845_v51, %v2388_v7  ;;  %v1069_v61 = vmax.f32 %v1007_v52, 0.0 }
 0x282   :  { %v1009_v55 = vpop.f32.mrf.mxu1 }
 0x283   :  { %v1010_v56 = vadd.f32 %v1009_v55, %v2381_v3  ;;  %v1072_v58 = vmax.f32 %v1018_v53, 0.0 }
 0x284   :  { %v1848_v60 = vpop.f32.mrf.mxu1 }
 0x285   :  { %v1070_v63 = vmax.f32 %v1010_v56, 0.0  ;;  %v1086_v37 = vpack.c.bf16 %v1072_v58, %v1071_v59  ;;  %v1031_v7 = vadd.f32 %v1848_v60, %v2406_v19 }
 0x286   :  { %v1022_v2 = vpop.f32.mrf.mxu1 }
 0x287   :  { %v1085_v25 = vpack.c.bf16 %v1070_v63, %v1069_v61  ;;  %v1023_v4 = vadd.f32 %v1022_v2, %v2394_v11  ;;  %v1075_v41 = vmax.f32 %v1031_v7, 0.0 }
 0x288   :  { %v1849_v33 = vpop.f32.mrf.mxu1 }
 0x289   :  { %v1034_v62 = vadd.f32 %v1849_v33, %v2412_v23  ;;  %1874 = vmatprep.mubr.bf16.mxu0 %v1085_v25  ;;  %v1073_v1 = vmax.f32 %v1023_v4, 0.0 }
 0x28a   :  { %v1025_v6 = vpop.f32.mrf.mxu1  ;;  %1875 = vmatmul.mubr.bf16.vlgmr.msra.gmra.mxu0 %v1086_v37 }
 0x28b   :  { %v1026_v3 = vadd.f32 %v1025_v6, %v2400_v15  ;;  %1891 = vmatpush3.bf16.msra.mxu0 %v1977_v45  ;;  %v1076_v29 = vmax.f32 %v1034_v62, 0.0 }
 0x28c   :  { %v1852_v5 = vpop.f32.mrf.mxu1  ;;  %1892 = vmatprep.subr.bf16.mxu0 %v1978_v46 }
 0x28d   :  { %v1074_v40 = vmax.f32 %v1026_v3, 0.0  ;;  %v1088_v11 = vpack.c.bf16 %v1076_v29, %v1075_v41  ;;  %v1047_v15 = vadd.f32 %v1852_v5, %v2430_v35 }
 0x28e   :  { %v1038_v43 = vpop.f32.mrf.mxu1 }
 0x28f   :  { %v1087_v44 = vpack.c.bf16 %v1074_v40, %v1073_v1  ;;  %1893 = vmatpush3.bf16.msra.mxu0 %v1978_v46  ;;  %v1039_v23 = vadd.f32 %v1038_v43, %v2418_v27  ;;  %v1079_v52 = vmax.f32 %v1047_v15, 0.0 }
 0x290   :  { %v1853_v42 = vpop.f32.mrf.mxu1  ;;  %1894 = vmatprep.subr.bf16.mxu0 %v1979_v47 }
 0x291   :  { %v1050_v19 = vadd.f32 %v1853_v42, %v2436_v39  ;;  %1878 = vmatprep.mubr.bf16.mxu0 %v1087_v44  ;;  %v1077_v51 = vmax.f32 %v1039_v23, 0.0 }
 0x292   :  { %v1041_v57 = vpop.f32.mrf.mxu1  ;;  %1879 = vmatmul.mubr.bf16.gmra.mxu0 %v1088_v11 }
 0x293   :  { %v1042_v45 = vadd.f32 %v1041_v57, %v2424_v31  ;;  %1895 = vmatpush3.bf16.msra.mxu0 %v1979_v47  ;;  %v1080_v21 = vmax.f32 %v1050_v19, 0.0 }
 0x294   :  { %v1856_v17 = vpop.f32.mrf.mxu1  ;;  %1896 = vmatprep.subr.bf16.mxu0 %v1980_v48 }
 0x295   :  { %v1078_v46 = vmax.f32 %v1042_v45, 0.0  ;;  %v1090_v27 = vpack.c.bf16 %v1080_v21, %v1079_v52  ;;  %v1063_v31 = vadd.f32 %v1856_v17, %v2442_v13  ;;  %v1984_v13 = vld [vmem:[%s2526_s6] sm:$0xff]  }
 0x296   :  { %v1054_v53 = vpop.f32.mrf.mxu1 }
 0x297   :  { %v1089_v54 = vpack.c.bf16 %v1078_v46, %v1077_v51  ;;  %1897 = vmatpush3.bf16.msra.mxu0 %v1980_v48  ;;  %v1055_v35 = vadd.f32 %v1054_v53, %v2438_v49  ;;  %v1083_v48 = vmax.f32 %v1063_v31, 0.0  ;;  %v1982_v49 = vld [vmem:[%s2526_s6 + $0x10] sm:$0xff]  }
 0x298   :  { %v1857_v55 = vpop.f32.mrf.mxu1  ;;  %1898 = vmatprep.subr.bf16.mxu0 %v2468_v50  ;;  %1927 = vmatprep.subr.bf16.mxu1 %v1982_v49 }
 0x299   :  { %v1066_v39 = vadd.f32 %v1857_v55, %v566_v9  ;;  %1882 = vmatprep.mubr.bf16.mxu0 %v1089_v54  ;;  %v1081_v60 = vmax.f32 %v1055_v35, 0.0  ;;  %1935 = vmatpush3.bf16.msra.mxu1 %v1982_v49 }
 0x29a   :  { %v1057_v47 = vpop.f32.mrf.mxu1  ;;  %1883 = vmatmul.mubr.bf16.gmra.mxu0 %v1090_v27 }
 0x29b   :  { %v1058_v56 = vadd.f32 %v1057_v47, %v2440_v0  ;;  %1899 = vmatpush3.bf16.msra.mxu0 %v2468_v50  ;;  %v1084_v58 = vmax.f32 %v1066_v39, 0.0  ;;  %v1983_v0 = vld [vmem:[%s2526_s6 + $0x8] sm:$0xff]  }
 0x29c   :  { %1900 = vmatprep.subr.bf16.mxu0 %v1982_v49  ;;  %1928 = vmatprep.subr.bf16.mxu1 %v1983_v0 }
 0x29d   :  { %v1082_v61 = vmax.f32 %v1058_v56, 0.0  ;;  %v1092_v59 = vpack.c.bf16 %v1084_v58, %v1083_v48  ;;  %1936 = vmatpush3.bf16.msra.mxu1 %v1983_v0 }
 0x29e   :  { %1929 = vmatprep.subr.bf16.mxu1 %v1984_v13 }
 0x29f   :  { %v1091_v63 = vpack.c.bf16 %v1082_v61, %v1081_v60  ;;  %1901 = vmatpush3.bf16.msra.mxu0 %v1982_v49 }
 0x2a0   :  { %1902 = vmatprep.subr.bf16.mxu0 %v1983_v0 }
 0x2a1   :  { %1886 = vmatprep.mubr.bf16.mxu0 %v1091_v63  ;;  %1937 = vmatpush3.bf16.msra.mxu1 %v1984_v13 }
 0x2a2   :  { %1887 = vmatmul.mubr.bf16.gmra.mxu0 %v1092_v59 }
 0x2a3   :  { %1903 = vmatpush3.bf16.msra.mxu0 %v1983_v0 }
 0x2a4   :  { %1904 = vmatprep.subr.bf16.mxu0 %v1984_v13 }
 0x2a7   :  { %1905 = vmatpush3.bf16.msra.mxu0 %v1984_v13 }
 0x34a   :  { %v1876_v50 = vpop.f32.mrf.mxu0 }
 0x34b   :  { %v1201_v33 = vadd.f32 %v1876_v50, %v2398_v14 }
 0x34c   :  { %v1192_v9 = vpop.f32.mrf.mxu0 }
 0x34d   :  { %v1193_v25 = vadd.f32 %v1192_v9, %v2392_v10  ;;  %v1257_v5 = vmax.f32 %v1201_v33, 0.0 }
 0x34e   :  { %v1877_v2 = vpop.f32.mrf.mxu0 }
 0x34f   :  { %v1204_v37 = vadd.f32 %v1877_v2, %v2396_v12  ;;  %v1255_v3 = vmax.f32 %v1193_v25, 0.0 }
 0x350   :  { %v1195_v4 = vpop.f32.mrf.mxu0 }
 0x351   :  { %v1196_v62 = vadd.f32 %v2390_v8, %v1195_v4  ;;  %v1258_v7 = vmax.f32 %v1204_v37, 0.0 }
 0x352   :  { %v1880_v6 = vpop.f32.mrf.mxu0 }
 0x353   :  { %v1256_v29 = vmax.f32 %v1196_v62, 0.0  ;;  %v1272_v41 = vpack.c.bf16 %v1258_v7, %v1257_v5  ;;  %v1217_v12 = vadd.f32 %v1880_v6, %v2410_v22 }
 0x354   :  { %v1208_v1 = vpop.f32.mrf.mxu0 }
 0x355   :  { %v1271_v40 = vpack.c.bf16 %v1256_v29, %v1255_v3  ;;  %v1209_v44 = vadd.f32 %v1208_v1, %v2404_v18  ;;  %v1261_v15 = vmax.f32 %v1217_v12, 0.0 }
 0x356   :  { %v1881_v43 = vpop.f32.mrf.mxu0 }
 0x357   :  { %v1220_v10 = vadd.f32 %v1881_v43, %v2408_v20  ;;  %1906 = vmatprep.mubr.bf16.mxu0 %v1271_v40  ;;  %v1259_v23 = vmax.f32 %v1209_v44, 0.0 }
 0x358   :  { %v1211_v14 = vpop.f32.mrf.mxu0  ;;  %1907 = vmatmul.mubr.bf16.vlgmr.msra.gmra.mxu0 %v1272_v41 }
 0x359   :  { %v1212_v8 = vadd.f32 %v2402_v16, %v1211_v14  ;;  %v1262_v11 = vmax.f32 %v1220_v10, 0.0 }
 0x35a   :  { %v1884_v42 = vpop.f32.mrf.mxu0 }
 0x35b   :  { %v1260_v19 = vmax.f32 %v1212_v8, 0.0  ;;  %v1274_v21 = vpack.c.bf16 %v1262_v11, %v1261_v15  ;;  %v1233_v22 = vadd.f32 %v1884_v42, %v2422_v30 }
 0x35c   :  { %v1224_v57 = vpop.f32.mrf.mxu0 }
 0x35d   :  { %v1273_v45 = vpack.c.bf16 %v1260_v19, %v1259_v23  ;;  %v1225_v18 = vadd.f32 %v1224_v57, %v2416_v26  ;;  %v1265_v27 = vmax.f32 %v1233_v22, 0.0 }
 0x35e   :  { %v1885_v17 = vpop.f32.mrf.mxu0 }
 0x35f   :  { %v1236_v20 = vadd.f32 %v1885_v17, %v2420_v28  ;;  %1910 = vmatprep.mubr.bf16.mxu1 %v1273_v45  ;;  %v1263_v53 = vmax.f32 %v1225_v18, 0.0 }
 0x360   :  { %v1227_v51 = vpop.f32.mrf.mxu0  ;;  %1911 = vmatmul.mubr.bf16.vlgmr.msra.gmra.mxu1 %v1274_v21 }
 0x361   :  { %v1228_v16 = vadd.f32 %v2414_v24, %v1227_v51  ;;  %v1266_v46 = vmax.f32 %v1236_v20, 0.0 }
 0x362   :  { %v1888_v52 = vpop.f32.mrf.mxu0 }
 0x363   :  { %v1264_v54 = vmax.f32 %v1228_v16, 0.0  ;;  %v1276_v39 = vpack.c.bf16 %v1266_v46, %v1265_v27  ;;  %v1249_v30 = vadd.f32 %v1888_v52, %v2434_v38 }
 0x364   :  { %v1240_v55 = vpop.f32.mrf.mxu0 }
 0x365   :  { %v1275_v35 = vpack.c.bf16 %v1264_v54, %v1263_v53  ;;  %v1241_v26 = vadd.f32 %v1240_v55, %v2428_v34  ;;  %v1269_v61 = vmax.f32 %v1249_v30, 0.0  ;;  %v1597_v34 = vld [vmem:[%s2527_s7] ss:$0 sm:$0xff]  ;;  %s2035_s7 = smov [#allocation5]  }
 0x366   :  { %v1889_v31 = vpop.f32.mrf.mxu0  ;;  %s1468_s21 = sshll.u32 %s2035_s7, 4  ;;  %s1469_s21 = int_to_ptr.vmem [resolvable:$true] %s1468_s21 }
 0x367   :  { %v1252_v28 = vadd.f32 %v1889_v31, %v2432_v36  ;;  %1914 = vmatprep.mubr.bf16.mxu1 %v1275_v35  ;;  %v1267_v58 = vmax.f32 %v1241_v26, 0.0  ;;  %s2005_s22 = scalar_lea.vmem %s1469_s21, 2048  ;;  %p2010_p6 = scmp.lt.s32.totalorder %s1469_s21, %s1469_s21 }
 0x368   :  { %v1243_v47 = vpop.f32.mrf.mxu0  ;;  %1915 = vmatmul.mubr.bf16.gmra.mxu1 %v1276_v39  ;;  %p2006_p5 = scmp.ne.s32.totalorder %s1469_s21, %s2005_s22  ;;  %p2011_p7 = scmp.lt.s32.totalorder %s2005_s22, %s2005_s22 }
 0x369   :  { %v1244_v24 = vadd.f32 %v2426_v32, %v1243_v47  ;;  %v1270_v56 = vmax.f32 %v1252_v28, 0.0 }
 0x36a   :  { %p2012_p8 = por %p2011_p7, %p2010_p6 }
 0x36b   :  { %v1268_v60 = vmax.f32 %v1244_v24, 0.0  ;;  %v1278_v63 = vpack.c.bf16 %v1270_v56, %v1269_v61 }
 0x36c   :  { %p2013_p9 = pnand %p2012_p8, %p2006_p5 }
 0x36d   :  { %v1277_v48 = vpack.c.bf16 %v1268_v60, %v1267_v58 }
 0x36f   :  { %1918 = vmatprep.mubr.bf16.mxu1 %v1277_v48 }
 0x370   :  { %1919 = vmatmul.mubr.bf16.gmra.mxu1 %v1278_v63 }
 0x418   :  { %v1908_v36 = vpop.f32.mrf.mxu0 }
 0x419   :  { %v1393_v59 = vadd.f32 %v1908_v36, %v1597_v34 }
 0x41a   :  { %v1384_v49 = vpop.f32.mrf.mxu0 }
 0x41b   :  { %1449 = vst [vmem:[#allocation5 + $0x10] sm:$0xff] %v1393_v59  ;;  %v1385_v38 = vadd.f32 %v1597_v34, %v1384_v49 }
 0x41c   :  { %v1909_v0 = vpop.f32.mrf.mxu0 }
 0x41d   :  { %1447 = vst [vmem:[#allocation5] sm:$0xff] %v1385_v38  ;;  %v1396_v32 = vadd.f32 %v1909_v0, %v1597_v34 }
 0x41e   :  { %v1387_v13 = vpop.f32.mrf.mxu0 }
 0x41f   :  { %1450 = vst [vmem:[#allocation5 + $0x18] sm:$0xff] %v1396_v32  ;;  %v1388_v50 = vadd.f32 %v1597_v34, %v1387_v13 }
 0x420   :  { %v1912_v9 = vpop.f32.mrf.mxu1 }
 0x421   :  { %1448 = vst [vmem:[#allocation5 + $0x8] sm:$0xff] %v1388_v50  ;;  %v1409_v2 = vadd.f32 %v1912_v9, %v1597_v34 }
 0x422   :  { %v1400_v25 = vpop.f32.mrf.mxu1 }
 0x423   :  { %1453 = vst [vmem:[#allocation5 + $0x30] sm:$0xff] %v1409_v2  ;;  %v1401_v37 = vadd.f32 %v1597_v34, %v1400_v25 }
 0x424   :  { %v1913_v33 = vpop.f32.mrf.mxu1 }
 0x425   :  { %1451 = vst [vmem:[#allocation5 + $0x20] sm:$0xff] %v1401_v37  ;;  %v1412_v4 = vadd.f32 %v1913_v33, %v1597_v34 }
 0x426   :  { %v1403_v62 = vpop.f32.mrf.mxu1 }
 0x427   :  { %1454 = vst [vmem:[#allocation5 + $0x38] sm:$0xff] %v1412_v4  ;;  %v1404_v7 = vadd.f32 %v1597_v34, %v1403_v62 }
 0x428   :  { %v1916_v6 = vpop.f32.mrf.mxu1 }
 0x429   :  { %1452 = vst [vmem:[#allocation5 + $0x28] sm:$0xff] %v1404_v7  ;;  %v1425_v3 = vadd.f32 %v1916_v6, %v1597_v34 }
 0x42a   :  { %v1416_v29 = vpop.f32.mrf.mxu1 }
 0x42b   :  { %1457 = vst [vmem:[#allocation5 + $0x50] sm:$0xff] %v1425_v3  ;;  %v1417_v5 = vadd.f32 %v1597_v34, %v1416_v29 }
 0x42c   :  { %v1917_v1 = vpop.f32.mrf.mxu1 }
 0x42d   :  { %1455 = vst [vmem:[#allocation5 + $0x40] sm:$0xff] %v1417_v5  ;;  %v1428_v40 = vadd.f32 %v1917_v1, %v1597_v34 }
 0x42e   :  { %v1419_v41 = vpop.f32.mrf.mxu1 }
 0x42f   :  { %1458 = vst [vmem:[#allocation5 + $0x58] sm:$0xff] %v1428_v40  ;;  %v1420_v43 = vadd.f32 %v1597_v34, %v1419_v41 }
 0x430   :  { %v1920_v44 = vpop.f32.mrf.mxu1 }
 0x431   :  { %1456 = vst [vmem:[#allocation5 + $0x48] sm:$0xff] %v1420_v43  ;;  %v1441_v10 = vadd.f32 %v1920_v44, %v1597_v34 }
 0x432   :  { %v1432_v12 = vpop.f32.mrf.mxu1 }
 0x433   :  { %1461 = vst [vmem:[#allocation5 + $0x70] sm:$0xff] %v1441_v10  ;;  %v1433_v14 = vadd.f32 %v1597_v34, %v1432_v12 }
 0x434   :  { %v1921_v8 = vpop.f32.mrf.mxu1 }
 0x435   :  { %1459 = vst [vmem:[#allocation5 + $0x60] sm:$0xff] %v1433_v14  ;;  %v1444_v11 = vadd.f32 %v1921_v8, %v1597_v34 }
 0x436   :  { %v1435_v42 = vpop.f32.mrf.mxu1 }
 0x437   :  { %1462 = vst [vmem:[#allocation5 + $0x78] sm:$0xff] %v1444_v11  ;;  %v1436_v23 = vadd.f32 %v1597_v34, %v1435_v42 }
 0x439   :  { %1460 = vst [vmem:[#allocation5 + $0x68] sm:$0xff] %v1436_v23 }
 0x43a   :  { %2016 = shalt.err (!%p2013_p9)
}
 0x43b   :  { %s2036_s23 = smov 128   ;;  %s2037_s24 = smov 8  }
 0x43c   :  { %1474 = dma.vmem_to_hbm [thread:$0]  %s1469_s21, 2048, %s2528_s8, [#allocation4], %s2036_s23, %s2036_s23, %s2037_s24  }
 0x43d   :  { %2027 = dma.done.wait [#allocation4], 2048  }
 0x43e   :  { %2028 = vsyncadd [#allocation4], 4294965248 }
 0x43f   :  { %1478 = vsyncpa [#allocation3], 1 }
 0x440   :  { %1479 = vsyncpa [#allocation4], 1 }

</bundles_post_ra>
